<compile_context>
chip_gen: v5e
topology: v5e:2x2
jax: 0.10.0
libtpu: 0.0.40
codegen_flags: <defaults>
</compile_context>

<pallas_src>
import math

import jax
import jax.numpy as jnp
from jax import lax
from jax.experimental import pallas as pl
from jax.experimental.pallas import tpu as pltpu


def _attention_kernel(q_ref, k_ref, v_ref, o_ref):
    # Blocks: (Gb, L2, D) for q/k/v/o.
    q = q_ref[...]
    k = k_ref[...]
    v = v_ref[...]

    d_k = q.shape[-1]
    scale = 1.0 / math.sqrt(d_k)
    # Fold the 1/sqrt(d_k) scale into Q (L2*D elements) instead of the
    # (L2, L2) scores.
    q = q * jnp.array(scale, dtype=q.dtype)

    # scores = Q @ K^T, contracting the LAST dims directly (no explicit
    # transpose of K). Operands keep their native dtype; MXU accumulates f32.
    scores = lax.dot_general(
        q, k,
        dimension_numbers=(((2,), (2,)), ((0,), (0,))),
        preferred_element_type=jnp.float32,
    )  # (Gb, L2, L2) f32

    # Numerically-stable softmax over the last axis, all in f32 (v5e-safe).
    m = jnp.max(scores, axis=-1, keepdims=True)
    e = jnp.exp(scores - m)                           # (Gb, L2, L2) f32
    denom = jnp.sum(e, axis=-1, keepdims=True)        # (Gb, L2, 1)  f32

    # Unnormalized context = e @ V (operands in V's dtype, f32 accumulation).
    ctx = lax.dot_general(
        e.astype(v.dtype), v,
        dimension_numbers=(((2,), (1,)), ((0,), (0,))),
        preferred_element_type=jnp.float32,
    )  # (Gb, L2, D) f32

    # Normalize after attn@V: one (Gb, L2, 1) EUP reciprocal + a (Gb, L2, D)
    # multiply instead of dividing the full (Gb, L2, L2) attention matrix.
    ctx = ctx * pl.reciprocal(denom, approx=True)
    o_ref[...] = ctx.astype(o_ref.dtype)


def _choose_block_g(G, L2, D, itemsize,
                    vmem_budget_bytes=16 * 1024 * 1024, cap=512):
    """Largest per-step G batch keeping double-buffered tiles + f32
    intermediates comfortably inside scoped VMEM on v5e/v6e/v7x."""
    per_g = (
        2 * 4 * L2 * D * itemsize   # q/k/v/o tiles, 2 pipeline buffers each
        + 3 * L2 * L2 * 4           # scores / exp intermediates (f32)
        + 2 * L2 * D * 4            # f32 context + headroom
    )
    gb = int(vmem_budget_bytes // max(per_g, 1))
    return max(1, min(gb, G, cap))


def t_scaled_dot_product_attention(Q, K, V, *, block_g=None):
    """Pallas TPU implementation of TScaledDotProductAttention.forward.

    Q, K, V: (B, n_heads, len1, len2, d_k). Returns context of same shape.
    """
    B, H, L1, L2, D = Q.shape
    G = B * H * L1
    itemsize = jnp.dtype(Q.dtype).itemsize

    q = Q.reshape(G, L2, D)
    k = K.reshape(G, L2, D)
    v = V.reshape(G, L2, D)

    gb = block_g if block_g is not None else _choose_block_g(G, L2, D, itemsize)
    num_blocks = pl.cdiv(G, gb)
    g_pad = num_blocks * gb
    if g_pad != G:
        # Pad with zeros so every block is full; padded slices are independent
        # (softmax of all-zero scores is finite) and sliced off afterwards.
        pad = ((0, g_pad - G), (0, 0), (0, 0))
        q = jnp.pad(q, pad)
        k = jnp.pad(k, pad)
        v = jnp.pad(v, pad)

    blk = pl.BlockSpec((gb, L2, D), lambda i: (i, 0, 0))

    cost = pl.CostEstimate(
        flops=4 * G * L2 * L2 * D,            # two matmuls, 2*L2*L2*D each
        transcendentals=G * L2 * L2,          # exp
        bytes_accessed=4 * G * L2 * D * itemsize,
    )

    out = pl.pallas_call(
        _attention_kernel,
        out_shape=jax.ShapeDtypeStruct((g_pad, L2, D), Q.dtype),
        grid_spec=pltpu.PrefetchScalarGridSpec(
            num_scalar_prefetch=0,
            grid=(num_blocks,),
            in_specs=[blk, blk, blk],
            out_specs=blk,
        ),
        compiler_params=pltpu.CompilerParams(
            dimension_semantics=("parallel",),
            vmem_limit_bytes=32 * 1024 * 1024,
        ),
        cost_estimate=cost,
    )(q, k, v)

    if g_pad != G:
        out = out[:G]
    return out.reshape(B, H, L1, L2, D)


def _reference(Q, K, V):
    d_k = Q.shape[-1]
    scores = jnp.einsum("bhlqd,bhlkd->bhlqk", Q, K) / jnp.sqrt(jnp.float32(d_k))
    attn = jax.nn.softmax(scores, axis=-1)
    return jnp.einsum("bhlqk,bhlkd->bhlqd", attn, V)


if __name__ == "__main__":
    # Small shapes consistent with the module's 5-D inputs.
    B, H, L1, L2, D = 2, 2, 4, 8, 16
    key = jax.random.PRNGKey(0)
    kq, kk, kv = jax.random.split(key, 3)
    Q = jax.random.normal(kq, (B, H, L1, L2, D), dtype=jnp.float32)
    K = jax.random.normal(kk, (B, H, L1, L2, D), dtype=jnp.float32)
    V = jax.random.normal(kv, (B, H, L1, L2, D), dtype=jnp.float32)

    out = t_scaled_dot_product_attention(Q, K, V)
    out = jax.block_until_ready(out)

    ref = _reference(Q, K, V)
    assert out.shape == (B, H, L1, L2, D)
    # approx=True reciprocal (EUP) trades ~1e-3-level precision on the softmax
    # normalization; compare with a correspondingly relaxed tolerance.
    assert jnp.allclose(out, ref, atol=5e-3, rtol=5e-3), "mismatch vs reference"

    print("KERNEL_OK")
</pallas_src>

<mosaic_0001>
module attributes {stable_mosaic.version = 11 : i64} {
  func.func @_attention_kernel(%arg0: i32, %arg1: memref<16x8x16xf32, #tpu.memory_space<vmem>>, %arg2: memref<16x8x16xf32, #tpu.memory_space<vmem>>, %arg3: memref<16x8x16xf32, #tpu.memory_space<vmem>>, %arg4: memref<16x8x16xf32, #tpu.memory_space<vmem>>) attributes {dimension_semantics = [#tpu.dimension_semantics<parallel>], iteration_bounds = array<i64: 1>, scalar_prefetch = 0 : i64, scratch_operands = 0 : i64, tpu.core_type = #tpu.core_type<tc>, window_params = [{transform_indices = @transform_0, window_bounds = array<i64: 16, 8, 16>}, {transform_indices = @transform_1, window_bounds = array<i64: 16, 8, 16>}, {transform_indices = @transform_2, window_bounds = array<i64: 16, 8, 16>}, {transform_indices = @transform_3, window_bounds = array<i64: 16, 8, 16>}]} {
    %c0 = arith.constant 0 : index
    %c0_0 = arith.constant 0 : index
    %c0_1 = arith.constant 0 : index
    %0 = vector.load %arg1[%c0, %c0_0, %c0_1] : memref<16x8x16xf32, #tpu.memory_space<vmem>>, vector<16x8x16xf32>
    %c0_2 = arith.constant 0 : index
    %c0_3 = arith.constant 0 : index
    %c0_4 = arith.constant 0 : index
    %1 = vector.load %arg2[%c0_2, %c0_3, %c0_4] : memref<16x8x16xf32, #tpu.memory_space<vmem>>, vector<16x8x16xf32>
    %c0_5 = arith.constant 0 : index
    %c0_6 = arith.constant 0 : index
    %c0_7 = arith.constant 0 : index
    %2 = vector.load %arg3[%c0_5, %c0_6, %c0_7] : memref<16x8x16xf32, #tpu.memory_space<vmem>>, vector<16x8x16xf32>
    %cst = arith.constant 2.500000e-01 : f32
    %3 = vector.broadcast %cst : f32 to vector<16x8x16xf32>
    %4 = arith.mulf %0, %3 : vector<16x8x16xf32>
    %cst_8 = arith.constant dense<0.000000e+00> : vector<16x8x8xf32>
    %5 = tpu.matmul %4, %1, %cst_8 {dimension_numbers = #tpu.dot_dimension_numbers<[2], [2], [1], [1], [0, 0, 0, 1, 1, 1], [0], [0]>} : vector<16x8x16xf32>, vector<16x8x16xf32>, vector<16x8x8xf32> -> vector<16x8x8xf32>
    %cst_9 = arith.constant dense<0xFF800000> : vector<16x8xf32>
    %6 = vector.multi_reduction <maximumf>, %5, %cst_9 [2] : vector<16x8x8xf32> to vector<16x8xf32>
    %7 = vector.shape_cast %6 : vector<16x8xf32> to vector<16x8x1xf32>
    %8 = vector.broadcast %7 : vector<16x8x1xf32> to vector<16x8x8xf32>
    %9 = arith.subf %5, %8 : vector<16x8x8xf32>
    %10 = math.exp %9 : vector<16x8x8xf32>
    %cst_10 = arith.constant dense<0.000000e+00> : vector<16x8xf32>
    %11 = vector.multi_reduction <add>, %10, %cst_10 [2] : vector<16x8x8xf32> to vector<16x8xf32>
    %12 = vector.shape_cast %11 : vector<16x8xf32> to vector<16x8x1xf32>
    %cst_11 = arith.constant dense<0.000000e+00> : vector<16x8x16xf32>
    %13 = tpu.matmul %10, %2, %cst_11 {dimension_numbers = #tpu.dot_dimension_numbers<[2], [1], [1], [2], [0, 0, 0, 1, 1, 2], [0], [0]>} : vector<16x8x8xf32>, vector<16x8x16xf32>, vector<16x8x16xf32> -> vector<16x8x16xf32>
    %14 = tpu.reciprocal %12 {approx = true} : vector<16x8x1xf32> -> vector<16x8x1xf32>
    %15 = vector.broadcast %14 : vector<16x8x1xf32> to vector<16x8x16xf32>
    %16 = arith.mulf %13, %15 : vector<16x8x16xf32>
    %c0_12 = arith.constant 0 : index
    %c0_13 = arith.constant 0 : index
    %c0_14 = arith.constant 0 : index
    %17 = vector.load %arg4[%c0_12, %c0_13, %c0_14] : memref<16x8x16xf32, #tpu.memory_space<vmem>>, vector<16x8x16xf32>
    tpu.vector_store %arg4[%c0_12, %c0_13, %c0_14], %16 {strides = array<i32>} : memref<16x8x16xf32, #tpu.memory_space<vmem>>, vector<16x8x16xf32>,
    return
  }
  func.func @transform_0(%arg0: i32) -> (i32, i32, i32) {
    %c0_i32 = arith.constant 0 : i32
    %c0_i32_0 = arith.constant 0 : i32
    %c0_i32_1 = arith.constant 0 : i32
    return %arg0, %c0_i32, %c0_i32_0 : i32, i32, i32
  }
  func.func @transform_1(%arg0: i32) -> (i32, i32, i32) {
    %c0_i32 = arith.constant 0 : i32
    %c0_i32_0 = arith.constant 0 : i32
    %c0_i32_1 = arith.constant 0 : i32
    return %arg0, %c0_i32, %c0_i32_0 : i32, i32, i32
  }
  func.func @transform_2(%arg0: i32) -> (i32, i32, i32) {
    %c0_i32 = arith.constant 0 : i32
    %c0_i32_0 = arith.constant 0 : i32
    %c0_i32_1 = arith.constant 0 : i32
    return %arg0, %c0_i32, %c0_i32_0 : i32, i32, i32
  }
  func.func @transform_3(%arg0: i32) -> (i32, i32, i32) {
    %c0_i32 = arith.constant 0 : i32
    %c0_i32_0 = arith.constant 0 : i32
    %c0_i32_1 = arith.constant 0 : i32
    return %arg0, %c0_i32, %c0_i32_0 : i32, i32, i32
  }
}

</mosaic_0001>

<bundles_post_ra>
// kernel: tpu_custom_call.1
= control target key start
LH: loop header
LB: loop body
LE: loop exit
PB: predicated region body
PF: predicated region fallthrough
CT: control target
= control target key end

     0   :  { %8 = vsyncpa [#allocation3], 0  ;;  %s1554_s0 = inlined_call_operand.hbm [shape: f32[16,8,16], index: 0, kind: input, shape index: {}]   ;;  %s1555_s1 = inlined_call_operand.hbm [shape: f32[16,8,16], index: 1, kind: input, shape index: {}]   ;;  %s1556_s2 = inlined_call_operand.hbm [shape: f32[16,8,16], index: 2, kind: input, shape index: {}]   ;;  %s1557_s3 = inlined_call_operand.hbm [shape: f32[16,8,16], index: 3, kind: output, shape index: {}]  }
   0x1   :  { %9 = vsyncpa [#allocation6], 0 }
   0x2   :  { %10 = vsyncpa [#allocation4], 0  ;;  %s28_s14 = sshll.u32 %s1555_s1, 4  ;;  %s1344_s15 = smov [#allocation5]   ;;  %s29_s14 = int_to_ptr.hbm [resolvable:$true] %s28_s14 }
   0x3   :  { %s30_s16 = sshll.u32 %s1344_s15, 4  ;;  %s15_s19 = sshll.u32 %s1554_s0, 4  ;;  %s31_s16 = int_to_ptr.vmem [resolvable:$true] %s30_s16  ;;  %s16_s19 = int_to_ptr.hbm [resolvable:$true] %s15_s19 }
   0x4   :  { %s1345_s20 = smov 128   ;;  %s1346_s21 = smov 8  }
   0x5   :  { %36 = dma.hbm_to_vmem [thread:$0]  %s29_s14, 2048, %s31_s16, [#allocation6], %s1345_s20, %s1345_s20, %s1346_s21  }
   0x6   :  { %s1347_s22 = smov [#allocation2]   ;;  %s41_s1 = sshll.u32 %s1556_s2, 4  ;;  %s42_s1 = int_to_ptr.hbm [resolvable:$true] %s41_s1 }
   0x7   :  { %s17_s23 = sshll.u32 %s1347_s22, 4  ;;  %s1348_s0 = smov [#allocation7]   ;;  %s18_s23 = int_to_ptr.vmem [resolvable:$true] %s17_s23 }
   0x8   :  { %23 = dma.hbm_to_vmem [thread:$0]  %s16_s19, 2048, %s18_s23, [#allocation3], %s1345_s20, %s1345_s20, %s1346_s21  }
   0x9   :  { %s43_s26 = sshll.u32 %s1348_s0, 4  ;;  %s44_s26 = int_to_ptr.vmem [resolvable:$true] %s43_s26 }
   0xa   :  { %49 = dma.hbm_to_vmem [thread:$0]  %s42_s1, 2048, %s44_s26, [#allocation6], %s1345_s20, %s1345_s20, %s1346_s21  }
   0xb   :  { %1338 = dma.done.wait [#allocation3], 2048  }
   0xc   :  { %1339 = vsyncadd [#allocation3], 4294965248 }
   0xd   :  { %1340 = dma.done.wait [#allocation6], 4096  }
   0xe   :  { %1341 = vsyncadd [#allocation6], 4294963200  ;;  %vm126_vm0 = vcmask 130048   ;;  %v78_v0 = vld [vmem:[#allocation5] sm:$0xff]  ;;  %v80_v1 = vld [vmem:[#allocation5 + $0x10] sm:$0xff]  ;;  %vm543_vm1 = vcmask 64512  }
   0xf   :  { %v81_v2 = vld [vmem:[#allocation5 + $0x18] sm:$0xff]  ;;  %1124 = vmatpush.xpose.msk.msra.mxu0 %vm126_vm0, %v78_v0  ;;  %1128 = vmatpush.xpose.msk.msra.mxu2 %vm126_vm0, %v80_v1  ;;  %v62_v3 = vld [vmem:[#allocation2] sm:$0xff]  ;;  %v64_v4 = vld [vmem:[#allocation2 + $0x10] sm:$0xff]  ;;  %s1349_s2 = smov [#allocation8]   ;;  %s1110_s30 = sshll.u32 %s1557_s3, 4  ;;  %s1111_s30 = int_to_ptr.hbm [resolvable:$true] %s1110_s30 }
  0x10   :  { %v84_v5 = vld [vmem:[#allocation5 + $0x30] sm:$0xff]  ;;  %1130 = vmatpush.xpose.msk.msra.mxu3 %vm126_vm0, %v81_v2  ;;  %v110_v6 = vmul.f32 0.25, %v62_v3  ;;  %v112_v7 = vmul.f32 0.25, %v64_v4  ;;  %v65_v8 = vld [vmem:[#allocation2 + $0x18] sm:$0xff]  ;;  %v79_v9 = vld [vmem:[#allocation5 + $0x8] sm:$0xff]  ;;  %s1108_s27 = sshll.u32 %s1349_s2, 4  ;;  %s1109_s27 = int_to_ptr.vmem [resolvable:$true] %s1108_s27 }
  0x11   :  { %v85_v10 = vld [vmem:[#allocation5 + $0x38] sm:$0xff]  ;;  %v113_v11 = vmul.f32 0.25, %v65_v8  ;;  %1126 = vmatpush.xpose.msk.msra.mxu1 %vm126_vm0, %v79_v9  ;;  %v63_v12 = vld [vmem:[#allocation2 + $0x8] sm:$0xff]  ;;  %v82_v14 = vld [vmem:[#allocation5 + $0x20] sm:$0xff] }
  0x12   :  { %1125 = vmatmul.msk.f32.vlgmr.msra.gmra.mxu0 %vm126_vm0, %v110_v6  ;;  %1129 = vmatmul.msk.f32.vlgmr.msra.gmra.mxu2 %vm126_vm0, %v112_v7  ;;  %v111_v13 = vmul.f32 0.25, %v63_v12  ;;  %v83_v15 = vld [vmem:[#allocation5 + $0x28] sm:$0xff]  ;;  %v89_v16 = vld [vmem:[#allocation5 + $0x58] sm:$0xff]  ;;  %v68_v17 = vld [vmem:[#allocation2 + $0x30] sm:$0xff] }
  0x13   :  { %1136 = vmatpush.xpose.msk.msrb.mxu2 %vm126_vm0, %v84_v5  ;;  %1131 = vmatmul.msk.f32.vlgmr.msra.gmra.mxu3 %vm126_vm0, %v113_v11  ;;  %v66_v18 = vld [vmem:[#allocation2 + $0x20] sm:$0xff]  ;;  %v88_v19 = vld [vmem:[#allocation5 + $0x50] sm:$0xff]  ;;  %v69_v20 = vld [vmem:[#allocation2 + $0x38] sm:$0xff]  ;;  %v116_v23 = vmul.f32 0.25, %v68_v17 }
  0x14   :  { %1138 = vmatpush.xpose.msk.msrb.mxu3 %vm126_vm0, %v85_v10  ;;  %1132 = vmatpush.xpose.msk.msrb.mxu0 %vm126_vm0, %v82_v14  ;;  %v86_v21 = vld [vmem:[#allocation5 + $0x40] sm:$0xff]  ;;  %v67_v22 = vld [vmem:[#allocation2 + $0x28] sm:$0xff]  ;;  %v114_v24 = vmul.f32 0.25, %v66_v18  ;;  %v117_v26 = vmul.f32 0.25, %v69_v20  ;;  %v92_v28 = vld [vmem:[#allocation5 + $0x70] sm:$0xff] }
  0x15   :  { %1127 = vmatmul.msk.f32.vlgmr.msra.gmra.mxu1 %vm126_vm0, %v111_v13  ;;  %v87_v25 = vld [vmem:[#allocation5 + $0x48] sm:$0xff]  ;;  %v115_v27 = vmul.f32 0.25, %v67_v22  ;;  %v93_v29 = vld [vmem:[#allocation5 + $0x78] sm:$0xff]  ;;  %v90_v30 = vld [vmem:[#allocation5 + $0x60] sm:$0xff] }
  0x16   :  { %1134 = vmatpush.xpose.msk.msrb.mxu1 %vm126_vm0, %v83_v15  ;;  %v91_v31 = vld [vmem:[#allocation5 + $0x68] sm:$0xff]  ;;  %v70_v32 = vld [vmem:[#allocation2 + $0x40] sm:$0xff]  ;;  %v72_v33 = vld [vmem:[#allocation2 + $0x50] sm:$0xff] }
  0x17   :  { %1144 = vmatpush.xpose.msk.msra.mxu2 %vm126_vm0, %v88_v19  ;;  %v73_v34 = vld [vmem:[#allocation2 + $0x58] sm:$0xff]  ;;  %v71_v35 = vld [vmem:[#allocation2 + $0x48] sm:$0xff]  ;;  %v118_v36 = vmul.f32 0.25, %v70_v32  ;;  %v120_v37 = vmul.f32 0.25, %v72_v33  ;;  %v76_v40 = vld [vmem:[#allocation2 + $0x70] sm:$0xff] }
  0x18   :  { %1146 = vmatpush.xpose.msk.msra.mxu3 %vm126_vm0, %v89_v16  ;;  %1140 = vmatpush.xpose.msk.msra.mxu0 %vm126_vm0, %v86_v21  ;;  %v121_v38 = vmul.f32 0.25, %v73_v34  ;;  %v119_v39 = vmul.f32 0.25, %v71_v35  ;;  %v74_v41 = vld [vmem:[#allocation2 + $0x60] sm:$0xff]  ;;  %v77_v42 = vld [vmem:[#allocation2 + $0x78] sm:$0xff]  ;;  %v75_v43 = vld [vmem:[#allocation2 + $0x68] sm:$0xff]  ;;  %v124_v44 = vmul.f32 0.25, %v76_v40 }
  0x19   :  { %v122_v45 = vmul.f32 0.25, %v74_v41  ;;  %v125_v46 = vmul.f32 0.25, %v77_v42  ;;  %v123_v47 = vmul.f32 0.25, %v75_v43  ;;  %v94_v16 = vld [vmem:[#allocation7] sm:$0xff]  ;;  %v96_v17 = vld [vmem:[#allocation7 + $0x10] sm:$0xff]  ;;  %v95_v18 = vld [vmem:[#allocation7 + $0x8] sm:$0xff] }
  0x1a   :  { %1142 = vmatpush.xpose.msk.msra.mxu1 %vm126_vm0, %v87_v25  ;;  %1137 = vmatmul.msk.f32.vlgmr.msrb.gmra.mxu2 %vm126_vm0, %v116_v23  ;;  %v97_v19 = vld [vmem:[#allocation7 + $0x18] sm:$0xff]  ;;  %v100_v20 = vld [vmem:[#allocation7 + $0x30] sm:$0xff]  ;;  %v99_v21 = vld [vmem:[#allocation7 + $0x28] sm:$0xff] }
  0x1b   :  { %1133 = vmatmul.msk.f32.vlgmr.msrb.gmra.mxu0 %vm126_vm0, %v114_v24  ;;  %1139 = vmatmul.msk.f32.vlgmr.msrb.gmra.mxu3 %vm126_vm0, %v117_v26  ;;  %v98_v24 = vld [vmem:[#allocation7 + $0x20] sm:$0xff]  ;;  %v101_v25 = vld [vmem:[#allocation7 + $0x38] sm:$0xff]  ;;  %v104_v41 = vld [vmem:[#allocation7 + $0x50] sm:$0xff] }
  0x1c   :  { %1152 = vmatpush.xpose.msk.msrb.mxu2 %vm126_vm0, %v92_v28  ;;  %1154 = vmatpush.xpose.msk.msrb.mxu3 %vm126_vm0, %v93_v29  ;;  %v102_v32 = vld [vmem:[#allocation7 + $0x40] sm:$0xff] }
  0x1d   :  { %1135 = vmatmul.msk.f32.vlgmr.msrb.gmra.mxu1 %vm126_vm0, %v115_v27  ;;  %1148 = vmatpush.xpose.msk.msrb.mxu0 %vm126_vm0, %v90_v30 }
  0x1e   :  { %1150 = vmatpush.xpose.msk.msrb.mxu1 %vm126_vm0, %v91_v31 }
  0x22   :  { %1145 = vmatmul.msk.f32.vlgmr.msra.gmra.mxu2 %vm126_vm0, %v120_v37 }
  0x23   :  { %1141 = vmatmul.msk.f32.vlgmr.msra.gmra.mxu0 %vm126_vm0, %v118_v36  ;;  %1147 = vmatmul.msk.f32.vlgmr.msra.gmra.mxu3 %vm126_vm0, %v121_v38 }
  0x24   :  { %706 = vmatpush.msra.mxu0 %v94_v16  ;;  %752 = vmatpush.msra.mxu2 %v96_v17 }
  0x25   :  { %1143 = vmatmul.msk.f32.vlgmr.msra.gmra.mxu1 %vm126_vm0, %v119_v39  ;;  %775 = vmatpush.msra.mxu3 %v97_v19  ;;  %v109_v19 = vld [vmem:[#allocation7 + $0x78] sm:$0xff] }
  0x26   :  { %729 = vmatpush.msra.mxu1 %v95_v18 }
  0x2a   :  { %1153 = vmatmul.msk.f32.vlgmr.msrb.gmra.mxu2 %vm126_vm0, %v124_v44 }
  0x2b   :  { %1149 = vmatmul.msk.f32.vlgmr.msrb.gmra.mxu0 %vm126_vm0, %v122_v45  ;;  %1155 = vmatmul.msk.f32.vlgmr.msrb.gmra.mxu3 %vm126_vm0, %v125_v46 }
  0x2c   :  { %844 = vmatpush.msrb.mxu2 %v100_v20  ;;  %798 = vmatpush.msrb.mxu0 %v98_v24 }
  0x2d   :  { %1151 = vmatmul.msk.f32.vlgmr.msrb.gmra.mxu1 %vm126_vm0, %v123_v47  ;;  %867 = vmatpush.msrb.mxu3 %v101_v25  ;;  %v103_v47 = vld [vmem:[#allocation7 + $0x48] sm:$0xff] }
  0x2e   :  { %821 = vmatpush.msrb.mxu1 %v99_v21 }
  0x8f   :  { %v1420_v48 = vpop.f32.mrf.mxu0 }
  0x90   :  { %v544_v49 = vsel %vm543_vm1, %v1420_v48, -inf }
  0x91   :  { %545 = vmax.xlane.f32.xlu1 %v544_v49 }
  0x92   :  { %v1424_v50 = vpop.f32.mrf.mxu1 }
  0x93   :  { %v547_v54 = vsel %vm543_vm1, %v1424_v50, -inf }
  0x95   :  { %v1426_v51 = vpop.f32.mrf.mxu2 }
  0x96   :  { %v1428_v52 = vpop.f32.mrf.mxu3  ;;  %v550_v53 = vsel %vm543_vm1, %v1426_v51, -inf }
  0x97   :  { %551 = vmax.xlane.f32.xlu0 %v550_v53  ;;  %v553_v57 = vsel %vm543_vm1, %v1428_v52, -inf }
  0x98   :  { %v1434_v55 = vpop.f32.mrf.mxu0 }
  0x99   :  { %548 = vmax.xlane.f32.xlu1 %v547_v54  ;;  %v556_v0 = vsel %vm543_vm1, %v1434_v55, -inf }
  0x9a   :  { %v1436_v56 = vpop.f32.mrf.mxu1 }
  0x9b   :  { %v559_v61 = vsel %vm543_vm1, %v1436_v56, -inf }
  0x9d   :  { %v1440_v58 = vpop.f32.mrf.mxu2 }
  0x9e   :  { %v1442_v59 = vpop.f32.mrf.mxu3  ;;  %v562_v60 = vsel %vm543_vm1, %v1440_v58, -inf }
  0x9f   :  { %554 = vmax.xlane.f32.xlu0 %v553_v57  ;;  %563 = vmax.xlane.f32.xlu2 %v562_v60  ;;  %v565_v63 = vsel %vm543_vm1, %v1442_v59, -inf }
  0xa0   :  { %v1448_v62 = vpop.f32.mrf.mxu0 }
  0xa1   :  { %560 = vmax.xlane.f32.xlu1 %v559_v61  ;;  %v568_v2 = vsel %vm543_vm1, %v1448_v62, -inf }
  0xa2   :  { %v1468_v8 = vpop.f32.mrf.mxu1 }
  0xa3   :  { %v571_v10 = vsel %vm543_vm1, %v1468_v8, -inf }
  0xa5   :  { %v1458_v3 = vpop.f32.mrf.mxu2 }
  0xa6   :  { %v1454_v1 = vpop.f32.mrf.mxu3  ;;  %v574_v4 = vsel %vm543_vm1, %v1458_v3, -inf }
  0xa7   :  { %566 = vmax.xlane.f32.xlu2 %v565_v63  ;;  %557 = vmax.xlane.f32.xlu0 %v556_v0  ;;  %v577_v5 = vsel %vm543_vm1, %v1454_v1, -inf  ;;  %v105_v63 = vld [vmem:[#allocation7 + $0x58] sm:$0xff] }
  0xa8   :  { %v1476_v12 = vpop.f32.mrf.mxu0 }
  0xa9   :  { %569 = vmax.xlane.f32.xlu1 %v568_v2  ;;  %v580_v15 = vsel %vm543_vm1, %v1476_v12, -inf }
  0xaa   :  { %v1478_v13 = vpop.f32.mrf.mxu1 }
  0xab   :  { %v583_v14 = vsel %vm543_vm1, %v1478_v13, -inf }
  0xad   :  { %v1470_v9 = vpop.f32.mrf.mxu2 }
  0xae   :  { %v1464_v6 = vpop.f32.mrf.mxu3  ;;  %v586_v11 = vsel %vm543_vm1, %v1470_v9, -inf }
  0xaf   :  { %575 = vmax.xlane.f32.xlu2 %v574_v4  ;;  %578 = vmax.xlane.f32.xlu0 %v577_v5  ;;  %v589_v7 = vsel %vm543_vm1, %v1464_v6, -inf  ;;  %v108_v4 = vld [vmem:[#allocation7 + $0x70] sm:$0xff] }
  0xb1   :  { %590 = vmax.xlane.f32.xlu1 %v589_v7 }
  0xb7   :  { %572 = vmax.xlane.f32.xlu2 %v571_v10  ;;  %587 = vmax.xlane.f32.xlu0 %v586_v11 }
  0xbf   :  { %584 = vmax.xlane.f32.xlu0 %v583_v14  ;;  %581 = vmax.xlane.f32.xlu2 %v580_v15 }
 0x104   :  { %v546_v22 = vpop.xlane.xlu1 %545 }
 0x105   :  { %v592_v23 = vsub.f32 %v1420_v48, %v546_v22 }
 0x107   :  { %v608_v26 = vmul.f32 1.442695, %v592_v23  ;;  %v106_v23 = vld [vmem:[#allocation7 + $0x60] sm:$0xff] }
 0x109   :  { %1178 = vpow2.f32 %v608_v26 }
 0x10a   :  { %v552_v27 = vpop.xlane.xlu0 %551 }
 0x10b   :  { %v594_v28 = vsub.f32 %v1426_v51, %v552_v27 }
 0x10c   :  { %v549_v29 = vpop.xlane.xlu1 %548 }
 0x10d   :  { %v612_v30 = vmul.f32 1.442695, %v594_v28  ;;  %v593_v31 = vsub.f32 %v1424_v50, %v549_v29 }
 0x10f   :  { %v1179_v33 = vpop.eup %1178  ;;  %1180 = vpow2.f32 %v612_v30  ;;  %v610_v34 = vmul.f32 1.442695, %v593_v31 }
 0x110   :  { %1156 = vmatmul.msk.f32.vlgmr.msra.gmra.mxu0 %vm543_vm1, %v1179_v33  ;;  %v640_v35 = vsel %vm543_vm1, %v1179_v33, 0.0 }
 0x111   :  { %1182 = vpow2.f32 %v610_v34  ;;  %641 = vadd.xlane.f32.xlu1 %v640_v35  ;;  %890 = vmatpush.msra.mxu0 %v102_v32 }
 0x112   :  { %v555_v36 = vpop.xlane.xlu0 %554  ;;  %v564_v37 = vpop.xlane.xlu2 %563 }
 0x113   :  { %v595_v38 = vsub.f32 %v1428_v52, %v555_v36  ;;  %v598_v39 = vsub.f32 %v1440_v58, %v564_v37 }
 0x114   :  { %v561_v40 = vpop.xlane.xlu1 %560 }
 0x115   :  { %v1181_v42 = vpop.eup %1180  ;;  %v614_v43 = vmul.f32 1.442695, %v595_v38  ;;  %v620_v44 = vmul.f32 1.442695, %v598_v39  ;;  %v597_v45 = vsub.f32 %v1436_v56, %v561_v40 }
 0x116   :  { %1158 = vmatmul.msk.f32.vlgmr.msra.gmra.mxu2 %vm543_vm1, %v1181_v42  ;;  %v646_v46 = vsel %vm543_vm1, %v1181_v42, 0.0 }
 0x117   :  { %v1183_v48 = vpop.eup %1182  ;;  %1184 = vpow2.f32 %v614_v43  ;;  %v618_v49 = vmul.f32 1.442695, %v597_v45  ;;  %647 = vadd.xlane.f32.xlu0 %v646_v46  ;;  %936 = vmatpush.msra.mxu2 %v104_v41 }
 0x118   :  { %1186 = vpow2.f32 %v620_v44  ;;  %1157 = vmatmul.msk.f32.vlgmr.msra.gmra.mxu1 %vm543_vm1, %v1183_v48  ;;  %v643_v50 = vsel %vm543_vm1, %v1183_v48, 0.0 }
 0x119   :  { %1188 = vpow2.f32 %v618_v49  ;;  %644 = vadd.xlane.f32.xlu2 %v643_v50  ;;  %913 = vmatpush.msra.mxu1 %v103_v47 }
 0x11a   :  { %v567_v51 = vpop.xlane.xlu2 %566  ;;  %v558_v52 = vpop.xlane.xlu0 %557 }
 0x11b   :  { %v599_v53 = vsub.f32 %v1442_v59, %v567_v51  ;;  %v596_v54 = vsub.f32 %v1434_v55, %v558_v52  ;;  %v107_v55 = vld [vmem:[#allocation7 + $0x68] sm:$0xff] }
 0x11c   :  { %v570_v56 = vpop.xlane.xlu1 %569 }
 0x11d   :  { %v1185_v57 = vpop.eup %1184  ;;  %v622_v58 = vmul.f32 1.442695, %v599_v53  ;;  %v616_v60 = vmul.f32 1.442695, %v596_v54  ;;  %v600_v61 = vsub.f32 %v1448_v62, %v570_v56 }
 0x11e   :  { %v1187_v0 = vpop.eup %1186  ;;  %1159 = vmatmul.msk.f32.vlgmr.msra.gmra.mxu3 %vm543_vm1, %v1185_v57  ;;  %v649_v2 = vsel %vm543_vm1, %v1185_v57, 0.0 }
 0x11f   :  { %v1189_v5 = vpop.eup %1188  ;;  %1190 = vpow2.f32 %v622_v58  ;;  %v624_v7 = vmul.f32 1.442695, %v600_v61  ;;  %1162 = vmatmul.msk.f32.vlgmr.msrb.gmra.mxu2 %vm543_vm1, %v1187_v0  ;;  %650 = vadd.xlane.f32.xlu1 %v649_v2  ;;  %v658_v22 = vsel %vm543_vm1, %v1187_v0, 0.0 }
 0x120   :  { %1192 = vpow2.f32 %v616_v60  ;;  %1161 = vmatmul.msk.f32.vlgmr.msrb.gmra.mxu1 %vm543_vm1, %v1189_v5  ;;  %v655_v59 = vsel %vm543_vm1, %v1189_v5, 0.0  ;;  %959 = vmatpush.msra.mxu3 %v105_v63 }
 0x121   :  { %1194 = vpow2.f32 %v624_v7  ;;  %656 = vadd.xlane.f32.xlu0 %v655_v59  ;;  %1028 = vmatpush.msrb.mxu2 %v108_v4 }
 0x122   :  { %v576_v62 = vpop.xlane.xlu2 %575  ;;  %v579_v10 = vpop.xlane.xlu0 %578  ;;  %1005 = vmatpush.msrb.mxu1 %v107_v55 }
 0x123   :  { %v602_v11 = vsub.f32 %v1458_v3, %v576_v62  ;;  %v603_v14 = vsub.f32 %v1454_v1, %v579_v10 }
 0x124   :  { %v591_v15 = vpop.xlane.xlu1 %590 }
 0x125   :  { %v1191_v16 = vpop.eup %1190  ;;  %v628_v17 = vmul.f32 1.442695, %v602_v11  ;;  %v630_v18 = vmul.f32 1.442695, %v603_v14  ;;  %v607_v21 = vsub.f32 %v1464_v6, %v591_v15 }
 0x126   :  { %v1193_v20 = vpop.eup %1192  ;;  %1163 = vmatmul.msk.f32.vlgmr.msrb.gmra.mxu3 %vm543_vm1, %v1191_v16  ;;  %v661_v33 = vsel %vm543_vm1, %v1191_v16, 0.0 }
 0x127   :  { %v1195_v24 = vpop.eup %1194  ;;  %1196 = vpow2.f32 %v628_v17  ;;  %1160 = vmatmul.msk.f32.vlgmr.msrb.gmra.mxu0 %vm543_vm1, %v1193_v20  ;;  %659 = vadd.xlane.f32.xlu1 %v658_v22  ;;  %v652_v1 = vsel %vm543_vm1, %v1193_v20, 0.0  ;;  %v638_v6 = vmul.f32 1.442695, %v607_v21 }
 0x128   :  { %1198 = vpow2.f32 %v630_v18  ;;  %653 = vadd.xlane.f32.xlu2 %v652_v1  ;;  %v664_v3 = vsel %vm543_vm1, %v1195_v24, 0.0  ;;  %1051 = vmatpush.msrb.mxu3 %v109_v19 }
 0x129   :  { %665 = vadd.xlane.f32.xlu0 %v664_v3  ;;  %982 = vmatpush.msrb.mxu0 %v106_v23  ;;  %1200 = vpow2.f32 %v638_v6 }
 0x12a   :  { %v573_v25 = vpop.xlane.xlu2 %572  ;;  %v588_v26 = vpop.xlane.xlu0 %587 }
 0x12b   :  { %v601_v27 = vsub.f32 %v1468_v8, %v573_v25  ;;  %v606_v28 = vsub.f32 %v1470_v9, %v588_v26 }
 0x12d   :  { %v1197_v29 = vpop.eup %1196  ;;  %v626_v30 = vmul.f32 1.442695, %v601_v27  ;;  %v636_v31 = vmul.f32 1.442695, %v606_v28 }
 0x12e   :  { %v1199_v32 = vpop.eup %1198  ;;  %1166 = vmatmul.msk.f32.vlgmr.msra.gmra.mxu2 %vm543_vm1, %v1197_v29  ;;  %v670_v43 = vsel %vm543_vm1, %v1197_v29, 0.0 }
 0x12f   :  { %1202 = vpow2.f32 %v626_v30  ;;  %1164 = vmatmul.msk.f32.vlgmr.msra.gmra.mxu0 %vm543_vm1, %v1195_v24  ;;  %1167 = vmatmul.msk.f32.vlgmr.msra.gmra.mxu3 %vm543_vm1, %v1199_v32  ;;  %v673_v8 = vsel %vm543_vm1, %v1199_v32, 0.0  ;;  %v1201_v37 = vpop.eup %1200 }
 0x130   :  { %1204 = vpow2.f32 %v636_v31  ;;  %662 = vadd.xlane.f32.xlu2 %v661_v33  ;;  %v685_v47 = vsel %vm543_vm1, %v1201_v37, 0.0 }
 0x131   :  { %674 = vadd.xlane.f32.xlu0 %v673_v8 }
 0x132   :  { %v585_v9 = vpop.xlane.xlu0 %584  ;;  %v582_v34 = vpop.xlane.xlu2 %581 }
 0x133   :  { %v605_v35 = vsub.f32 %v1478_v13, %v585_v9  ;;  %v604_v36 = vsub.f32 %v1476_v12, %v582_v34 }
 0x135   :  { %v1203_v38 = vpop.eup %1202  ;;  %v634_v39 = vmul.f32 1.442695, %v605_v35  ;;  %v632_v40 = vmul.f32 1.442695, %v604_v36 }
 0x136   :  { %v1205_v41 = vpop.eup %1204  ;;  %1165 = vmatmul.msk.f32.vlgmr.msra.gmra.mxu1 %vm543_vm1, %v1203_v38  ;;  %v667_v42 = vsel %vm543_vm1, %v1203_v38, 0.0 }
 0x137   :  { %1206 = vpow2.f32 %v634_v39  ;;  %1170 = vmatmul.msk.f32.vlgmr.msrb.gmra.mxu2 %vm543_vm1, %v1205_v41  ;;  %1171 = vmatmul.msk.f32.vlgmr.msrb.gmra.mxu3 %vm543_vm1, %v1201_v37  ;;  %v682_v12 = vsel %vm543_vm1, %v1205_v41, 0.0 }
 0x138   :  { %1208 = vpow2.f32 %v632_v40  ;;  %668 = vadd.xlane.f32.xlu1 %v667_v42  ;;  %671 = vadd.xlane.f32.xlu2 %v670_v43 }
 0x139   :  { %683 = vadd.xlane.f32.xlu0 %v682_v12 }
 0x13d   :  { %v1207_v13 = vpop.eup %1206 }
 0x13e   :  { %v1209_v44 = vpop.eup %1208  ;;  %1169 = vmatmul.msk.f32.vlgmr.msrb.gmra.mxu1 %vm543_vm1, %v1207_v13  ;;  %v679_v45 = vsel %vm543_vm1, %v1207_v13, 0.0 }
 0x13f   :  { %1168 = vmatmul.msk.f32.vlgmr.msrb.gmra.mxu0 %vm543_vm1, %v1209_v44  ;;  %v676_v46 = vsel %vm543_vm1, %v1209_v44, 0.0 }
 0x140   :  { %680 = vadd.xlane.f32.xlu2 %v679_v45  ;;  %677 = vadd.xlane.f32.xlu1 %v676_v46 }
 0x148   :  { %686 = vadd.xlane.f32.xlu1 %v685_v47 }
 0x184   :  { %v642_v48 = vpop.xlane.xlu1 %641 }
 0x185   :  { %1210 = vrcp.f32 %v642_v48 }
 0x18a   :  { %v648_v49 = vpop.xlane.xlu0 %647 }
 0x18b   :  { %v1211_v51 = vpop.eup %1210 }
 0x18c   :  { %v645_v50 = vpop.xlane.xlu2 %644 }
 0x18d   :  { %v708_v52 = vpop.f32.mrf.mxu0  ;;  %1212 = vrcp.f32 %v645_v50 }
 0x18e   :  { %v1072_v53 = vmul.f32 %v1211_v51, %v708_v52  ;;  %1214 = vrcp.f32 %v648_v49 }
 0x190   :  { %1088 = vst.msk [vmem:[#allocation8] sm:$0xff] %vm126_vm0, %v1072_v53 }
 0x192   :  { %v651_v54 = vpop.xlane.xlu1 %650 }
 0x193   :  { %v1213_v57 = vpop.eup %1212 }
 0x194   :  { %v657_v56 = vpop.xlane.xlu0 %656  ;;  %v1215_v61 = vpop.eup %1214 }
 0x195   :  { %v731_v58 = vpop.f32.mrf.mxu1  ;;  %1216 = vrcp.f32 %v657_v56 }
 0x196   :  { %v1073_v60 = vmul.f32 %v1213_v57, %v731_v58  ;;  %1218 = vrcp.f32 %v651_v54 }
 0x198   :  { %1089 = vst.msk [vmem:[#allocation8 + $0x8] sm:$0xff] %vm126_vm0, %v1073_v60 }
 0x199   :  { %v754_v63 = vpop.f32.mrf.mxu2 }
 0x19a   :  { %v1074_v0 = vmul.f32 %v1215_v61, %v754_v63  ;;  %v660_v2 = vpop.xlane.xlu1 %659 }
 0x19b   :  { %1220 = vrcp.f32 %v660_v2  ;;  %v654_v4 = vpop.xlane.xlu2 %653  ;;  %v1217_v5 = vpop.eup %1216 }
 0x19c   :  { %1090 = vst.msk [vmem:[#allocation8 + $0x10] sm:$0xff] %vm126_vm0, %v1074_v0  ;;  %v666_v7 = vpop.xlane.xlu0 %665  ;;  %1222 = vrcp.f32 %v654_v4  ;;  %v1219_v62 = vpop.eup %1218 }
 0x19d   :  { %v823_v55 = vpop.f32.mrf.mxu1 }
 0x19e   :  { %v1077_v59 = vmul.f32 %v1217_v5, %v823_v55 }
 0x1a0   :  { %1093 = vst.msk [vmem:[#allocation8 + $0x28] sm:$0xff] %vm126_vm0, %v1077_v59 }
 0x1a1   :  { %v1221_v10 = vpop.eup %1220  ;;  %v777_v11 = vpop.f32.mrf.mxu3 }
 0x1a2   :  { %v1075_v14 = vmul.f32 %v1219_v62, %v777_v11  ;;  %v846_v15 = vpop.f32.mrf.mxu2  ;;  %v1223_v18 = vpop.eup %1222 }
 0x1a3   :  { %v1078_v16 = vmul.f32 %v1221_v10, %v846_v15  ;;  %v663_v17 = vpop.xlane.xlu2 %662 }
 0x1a4   :  { %1091 = vst.msk [vmem:[#allocation8 + $0x18] sm:$0xff] %vm126_vm0, %v1075_v14  ;;  %1224 = vrcp.f32 %v663_v17  ;;  %v800_v19 = vpop.f32.mrf.mxu0  ;;  %v675_v21 = vpop.xlane.xlu0 %674 }
 0x1a5   :  { %1094 = vst.msk [vmem:[#allocation8 + $0x30] sm:$0xff] %vm126_vm0, %v1078_v16  ;;  %v1076_v20 = vmul.f32 %v1223_v18, %v800_v19  ;;  %1226 = vrcp.f32 %v666_v7 }
 0x1a6   :  { %1228 = vrcp.f32 %v675_v21 }
 0x1a7   :  { %1092 = vst.msk [vmem:[#allocation8 + $0x20] sm:$0xff] %vm126_vm0, %v1076_v20 }
 0x1a9   :  { %v869_v22 = vpop.f32.mrf.mxu3 }
 0x1aa   :  { %v1225_v23 = vpop.eup %1224 }
 0x1ab   :  { %v1079_v24 = vmul.f32 %v1225_v23, %v869_v22  ;;  %v669_v1 = vpop.xlane.xlu1 %668  ;;  %v672_v3 = vpop.xlane.xlu2 %671 }
 0x1ac   :  { %v1227_v6 = vpop.eup %1226  ;;  %v892_v25 = vpop.f32.mrf.mxu0  ;;  %1230 = vrcp.f32 %v672_v3 }
 0x1ad   :  { %1095 = vst.msk [vmem:[#allocation8 + $0x38] sm:$0xff] %vm126_vm0, %v1079_v24  ;;  %v1080_v26 = vmul.f32 %v1227_v6, %v892_v25  ;;  %1232 = vrcp.f32 %v669_v1  ;;  %v684_v27 = vpop.xlane.xlu0 %683  ;;  %v1229_v29 = vpop.eup %1228 }
 0x1ae   :  { %1234 = vrcp.f32 %v684_v27 }
 0x1af   :  { %1096 = vst.msk [vmem:[#allocation8 + $0x40] sm:$0xff] %vm126_vm0, %v1080_v26 }
 0x1b1   :  { %v938_v28 = vpop.f32.mrf.mxu2 }
 0x1b2   :  { %v961_v30 = vpop.f32.mrf.mxu3  ;;  %v1231_v31 = vpop.eup %1230 }
 0x1b3   :  { %v1083_v32 = vmul.f32 %v1229_v29, %v961_v30  ;;  %v678_v33 = vpop.xlane.xlu1 %677  ;;  %v681_v8 = vpop.xlane.xlu2 %680  ;;  %v1082_v34 = vmul.f32 %v1231_v31, %v938_v28 }
 0x1b4   :  { %v1233_v9 = vpop.eup %1232  ;;  %v915_v35 = vpop.f32.mrf.mxu1  ;;  %1236 = vrcp.f32 %v678_v33 }
 0x1b5   :  { %1099 = vst.msk [vmem:[#allocation8 + $0x58] sm:$0xff] %vm126_vm0, %v1083_v32  ;;  %v1081_v36 = vmul.f32 %v1233_v9, %v915_v35  ;;  %1238 = vrcp.f32 %v681_v8  ;;  %v1235_v37 = vpop.eup %1234 }
 0x1b6   :  { %1098 = vst.msk [vmem:[#allocation8 + $0x50] sm:$0xff] %vm126_vm0, %v1082_v34 }
 0x1b7   :  { %1097 = vst.msk [vmem:[#allocation8 + $0x48] sm:$0xff] %vm126_vm0, %v1081_v36 }
 0x1ba   :  { %v1030_v38 = vpop.f32.mrf.mxu2  ;;  %v1237_v39 = vpop.eup %1236 }
 0x1bb   :  { %v1086_v40 = vmul.f32 %v1235_v37, %v1030_v38  ;;  %v687_v41 = vpop.xlane.xlu1 %686  ;;  %v1239_v42 = vpop.eup %1238 }
 0x1bc   :  { %1240 = vrcp.f32 %v687_v41  ;;  %v984_v43 = vpop.f32.mrf.mxu0  ;;  %v1007_v12 = vpop.f32.mrf.mxu1 }
 0x1bd   :  { %1102 = vst.msk [vmem:[#allocation8 + $0x70] sm:$0xff] %vm126_vm0, %v1086_v40  ;;  %v1084_v13 = vmul.f32 %v1237_v39, %v984_v43  ;;  %v1085_v44 = vmul.f32 %v1239_v42, %v1007_v12  ;;  %v1053_v46 = vpop.f32.mrf.mxu3 }
 0x1bf   :  { %1100 = vst.msk [vmem:[#allocation8 + $0x60] sm:$0xff] %vm126_vm0, %v1084_v13 }
 0x1c0   :  { %1101 = vst.msk [vmem:[#allocation8 + $0x68] sm:$0xff] %vm126_vm0, %v1085_v44 }
 0x1c2   :  { %v1241_v45 = vpop.eup %1240 }
 0x1c3   :  { %v1087_v47 = vmul.f32 %v1241_v45, %v1053_v46 }
 0x1c5   :  { %1103 = vst.msk [vmem:[#allocation8 + $0x78] sm:$0xff] %vm126_vm0, %v1087_v47 }
 0x1c6   :  { %1116 = dma.vmem_to_hbm [thread:$0]  %s1109_s27, 2048, %s1111_s30, [#allocation4], %s1345_s20, %s1345_s20, %s1346_s21  }
 0x1c7   :  { %1342 = dma.done.wait [#allocation4], 2048  }
 0x1c8   :  { %1343 = vsyncadd [#allocation4], 4294965248 }
 0x1c9   :  { %1121 = vsyncpa [#allocation3], 1 }
 0x1ca   :  { %1122 = vsyncpa [#allocation6], 1 }
 0x1cb   :  { %1123 = vsyncpa [#allocation4], 1 }

</bundles_post_ra>
